<compile_context>
chip_gen: v7x
topology: tpu7x:2x2x1
jax: 0.10.0
libtpu: 0.0.40
codegen_flags: <defaults>
</compile_context>

<pallas_src>
import functools

import jax
import jax.numpy as jnp
from jax import lax
from jax.experimental import pallas as pl
from jax.experimental.pallas import tpu as pltpu

# ---- small, module-consistent hyperparameters -------------------------------
N_EMBD = 32        # n_embd
N_HEAD = 4         # n_head
HEAD_SIZE = N_EMBD // N_HEAD
BLOCK_SIZE = 8     # T (sequence length / block_size)
BATCH = 2
LN_EPS = 1e-5      # PyTorch nn.LayerNorm default
NEG_BIG = -1e30    # finite mask fill (diagonal is always unmasked -> no NaN)


def _layer_norm(v, gamma, beta):
    mu = jnp.mean(v, axis=-1, keepdims=True)
    var = jnp.mean((v - mu) ** 2, axis=-1, keepdims=True)
    return (v - mu) * lax.rsqrt(var + LN_EPS) * gamma + beta


def block_kernel(x_ref,        # (T, C)     current batch element
                 wqkv_ref,     # (C, 3C)    fused [Wq | Wk | Wv]
                 wp_ref,       # (C, C)     attention output projection
                 w1_ref,       # (C, 4C)    ffwd hidden weight
                 w2_ref,       # (4C, C)    ffwd output weight
                 pc_ref,       # (6, C)     packed [g1, b1, g2, b2, bp, b2_ff]
                 fb1_ref,      # (1, 4C)    ffwd hidden bias
                 o_ref,        # (T, C)
                 *, n_head, head_size):
    T, C = x_ref.shape
    H, hs = n_head, head_size

    x = x_ref[...]
    pc = pc_ref[...]
    g1, b1n = pc[0:1], pc[1:2]
    g2, b2n = pc[2:3], pc[3:4]
    bp, fb2 = pc[4:5], pc[5:6]

    # ---- LayerNorm 1 ---------------------------------------------------------
    ln1 = _layer_norm(x, g1, b1n)                                    # (T, C)

    # ---- fused QKV projection: one lane-dense MXU matmul ---------------------
    qkv = jnp.dot(ln1, wqkv_ref[...],
                  preferred_element_type=jnp.float32)                # (T, 3C)

    scale = float(hs) ** -0.5
    q3 = (qkv[:, 0 * C:1 * C] * scale).reshape(T, H, hs)             # (T, H, hs)
    k3 = qkv[:, 1 * C:2 * C].reshape(T, H, hs)
    v3 = qkv[:, 2 * C:3 * C].reshape(T, H, hs)

    # Plain causal mask (batch handled by the grid, not a block-diagonal mask).
    row = lax.broadcasted_iota(jnp.int32, (T, T), 0)
    col = lax.broadcasted_iota(jnp.int32, (T, T), 1)
    causal = col <= row                                              # (T, T)

    scores = jnp.einsum('qhd,khd->hqk', q3, k3,
                        preferred_element_type=jnp.float32)          # (H, T, T)
    scores = jnp.where(causal, scores, NEG_BIG)
    scores = scores - jnp.max(scores, axis=-1, keepdims=True)
    p = jnp.exp(scores)
    p = p * pl.reciprocal(jnp.sum(p, axis=-1, keepdims=True), approx=True)

    att = jnp.einsum('hqk,khd->qhd', p, v3,
                     preferred_element_type=jnp.float32)             # (T, H, hs)
    # Lane merge back to the concatenated-heads layout, then one (C,C) matmul.
    sa = jnp.dot(att.reshape(T, H * hs), wp_ref[...],
                 preferred_element_type=jnp.float32) + bp            # (T, C)

    x1 = x + sa  # first residual

    # ---- LayerNorm 2 + FeedForward -------------------------------------------
    ln2 = _layer_norm(x1, g2, b2n)
    h1 = jnp.maximum(
        jnp.dot(ln2, w1_ref[...], preferred_element_type=jnp.float32)
        + fb1_ref[...], 0.0)                                         # (T, 4C)
    ff = jnp.dot(h1, w2_ref[...], preferred_element_type=jnp.float32) + fb2

    o_ref[...] = (x1 + ff).astype(o_ref.dtype)


def block_forward(x, params):
    """x: (B, T, C) float32; params: dict of weights (see init_params)."""
    B, T, C = x.shape
    H, hs = N_HEAD, HEAD_SIZE

    # Wrapper-side (free) layout prep: fused QKV weight, packed small params.
    wqkv = jnp.concatenate([params["wq"], params["wk"], params["wv"]], axis=1)
    packed_c = jnp.concatenate(
        [params["ln1_g"], params["ln1_b"],
         params["ln2_g"], params["ln2_b"],
         params["bp"], params["b2"]], axis=0)                        # (6, C)

    kernel = functools.partial(block_kernel, n_head=H, head_size=hs)

    out = pl.pallas_call(
        kernel,
        out_shape=jax.ShapeDtypeStruct((B, T, C), x.dtype),
        grid=(B,),
        in_specs=[
            pl.BlockSpec((None, T, C), lambda b: (b, 0, 0)),   # x (per batch)
            pl.BlockSpec((C, 3 * C), lambda b: (0, 0)),        # fused Wqkv
            pl.BlockSpec((C, C), lambda b: (0, 0)),            # Wp
            pl.BlockSpec((C, 4 * C), lambda b: (0, 0)),        # W1
            pl.BlockSpec((4 * C, C), lambda b: (0, 0)),        # W2
            pl.BlockSpec((6, C), lambda b: (0, 0)),            # packed (1,C) params
            pl.BlockSpec((1, 4 * C), lambda b: (0, 0)),        # ffwd hidden bias
        ],
        out_specs=pl.BlockSpec((None, T, C), lambda b: (b, 0, 0)),
        compiler_params=pltpu.CompilerParams(
            dimension_semantics=("parallel",)),
    )(x, wqkv, params["wp"], params["w1"], params["w2"], packed_c, params["b1"])

    return out


def init_params(key, C, H, hs):
    ks = jax.random.split(key, 8)
    s = 0.02
    return {
        "ln1_g": jnp.ones((1, C), jnp.float32),
        "ln1_b": jnp.zeros((1, C), jnp.float32),
        "wq": s * jax.random.normal(ks[0], (C, H * hs), jnp.float32),
        "wk": s * jax.random.normal(ks[1], (C, H * hs), jnp.float32),
        "wv": s * jax.random.normal(ks[2], (C, H * hs), jnp.float32),
        "wp": s * jax.random.normal(ks[3], (H * hs, C), jnp.float32),
        "bp": s * jax.random.normal(ks[4], (1, C), jnp.float32),
        "ln2_g": jnp.ones((1, C), jnp.float32),
        "ln2_b": jnp.zeros((1, C), jnp.float32),
        "w1": s * jax.random.normal(ks[5], (C, 4 * C), jnp.float32),
        "b1": jnp.zeros((1, 4 * C), jnp.float32),
        "w2": s * jax.random.normal(ks[6], (4 * C, C), jnp.float32),
        "b2": jnp.zeros((1, C), jnp.float32),
    }


def block_reference(x, p):
    """Pure-JAX reference (mirrors the PyTorch forward, eval mode)."""
    B, T, C = x.shape
    H, hs = N_HEAD, HEAD_SIZE

    ln1 = _layer_norm(x, p["ln1_g"][0], p["ln1_b"][0])
    q = ln1 @ p["wq"]
    k = ln1 @ p["wk"]
    v = ln1 @ p["wv"]
    qh = q.reshape(B, T, H, hs).transpose(0, 2, 1, 3)
    kh = k.reshape(B, T, H, hs).transpose(0, 2, 1, 3)
    vh = v.reshape(B, T, H, hs).transpose(0, 2, 1, 3)
    wei = jnp.einsum("bhqd,bhkd->bhqk", qh, kh) * (hs ** -0.5)
    mask = jnp.tril(jnp.ones((T, T), bool))
    wei = jnp.where(mask, wei, -jnp.inf)
    wei = jax.nn.softmax(wei, axis=-1)
    out = jnp.einsum("bhqk,bhkd->bhqd", wei, vh)
    out = out.transpose(0, 2, 1, 3).reshape(B, T, H * hs)
    sa = out @ p["wp"] + p["bp"][0]
    x1 = x + sa
    ln2 = _layer_norm(x1, p["ln2_g"][0], p["ln2_b"][0])
    ff = jnp.maximum(ln2 @ p["w1"] + p["b1"][0], 0.0) @ p["w2"] + p["b2"][0]
    return x1 + ff


if __name__ == "__main__":
    key = jax.random.PRNGKey(0)
    kx, kp = jax.random.split(key)
    x = jax.random.normal(kx, (BATCH, BLOCK_SIZE, N_EMBD), jnp.float32)
    params = init_params(kp, N_EMBD, N_HEAD, HEAD_SIZE)

    y = block_forward(x, params)
    y = jax.block_until_ready(y)

    y_ref = block_reference(x, params)
    # Tolerance accounts for the EUP approx-reciprocal in the softmax denominator.
    assert jnp.allclose(y, y_ref, atol=1e-3, rtol=1e-3), "mismatch vs reference"
    print("KERNEL_OK")
</pallas_src>

<mosaic_0001>
module attributes {stable_mosaic.version = 11 : i64} {
  func.func @block_kernel(%arg0: i32, %arg1: memref<1x8x32xf32, #tpu.memory_space<vmem>>, %arg2: memref<32x96xf32, #tpu.memory_space<vmem>>, %arg3: memref<32x32xf32, #tpu.memory_space<vmem>>, %arg4: memref<32x128xf32, #tpu.memory_space<vmem>>, %arg5: memref<128x32xf32, #tpu.memory_space<vmem>>, %arg6: memref<6x32xf32, #tpu.memory_space<vmem>>, %arg7: memref<1x128xf32, #tpu.memory_space<vmem>>, %arg8: memref<1x8x32xf32, #tpu.memory_space<vmem>>) attributes {dimension_semantics = [#tpu.dimension_semantics<parallel>], iteration_bounds = array<i64: 2>, scalar_prefetch = 0 : i64, scratch_operands = 0 : i64, tpu.core_type = #tpu.core_type<tc>, window_params = [{transform_indices = @transform_0, window_bounds = array<i64: 1, 8, 32>}, {pipeline_mode = #tpu.pipeline_mode<synchronous>, transform_indices = @transform_1, window_bounds = array<i64: 32, 96>}, {pipeline_mode = #tpu.pipeline_mode<synchronous>, transform_indices = @transform_2, window_bounds = array<i64: 32, 32>}, {pipeline_mode = #tpu.pipeline_mode<synchronous>, transform_indices = @transform_3, window_bounds = array<i64: 32, 128>}, {pipeline_mode = #tpu.pipeline_mode<synchronous>, transform_indices = @transform_4, window_bounds = array<i64: 128, 32>}, {pipeline_mode = #tpu.pipeline_mode<synchronous>, transform_indices = @transform_5, window_bounds = array<i64: 6, 32>}, {pipeline_mode = #tpu.pipeline_mode<synchronous>, transform_indices = @transform_6, window_bounds = array<i64: 1, 128>}, {transform_indices = @transform_7, window_bounds = array<i64: 1, 8, 32>}]} {
    %c0 = arith.constant 0 : index
    %c0_0 = arith.constant 0 : index
    %c0_1 = arith.constant 0 : index
    %0 = vector.load %arg1[%c0, %c0_0, %c0_1] : memref<1x8x32xf32, #tpu.memory_space<vmem>>, vector<1x8x32xf32>
    %1 = vector.shape_cast %0 : vector<1x8x32xf32> to vector<8x32xf32>
    %c0_2 = arith.constant 0 : index
    %c0_3 = arith.constant 0 : index
    %2 = vector.load %arg6[%c0_2, %c0_3] : memref<6x32xf32, #tpu.memory_space<vmem>>, vector<6x32xf32>
    %3 = vector.extract_strided_slice %2 {offsets = [0, 0], sizes = [1, 32], strides = [1, 1]} : vector<6x32xf32> to vector<1x32xf32>
    %4 = vector.extract_strided_slice %2 {offsets = [1, 0], sizes = [1, 32], strides = [1, 1]} : vector<6x32xf32> to vector<1x32xf32>
    %5 = vector.extract_strided_slice %2 {offsets = [2, 0], sizes = [1, 32], strides = [1, 1]} : vector<6x32xf32> to vector<1x32xf32>
    %6 = vector.extract_strided_slice %2 {offsets = [3, 0], sizes = [1, 32], strides = [1, 1]} : vector<6x32xf32> to vector<1x32xf32>
    %7 = vector.extract_strided_slice %2 {offsets = [4, 0], sizes = [1, 32], strides = [1, 1]} : vector<6x32xf32> to vector<1x32xf32>
    %8 = vector.extract_strided_slice %2 {offsets = [5, 0], sizes = [1, 32], strides = [1, 1]} : vector<6x32xf32> to vector<1x32xf32>
    %cst = arith.constant dense<0.000000e+00> : vector<8xf32>
    %9 = vector.multi_reduction <add>, %1, %cst [1] : vector<8x32xf32> to vector<8xf32>
    %10 = vector.shape_cast %9 : vector<8xf32> to vector<8x1xf32>
    %cst_4 = arith.constant 3.200000e+01 : f32
    %11 = vector.broadcast %cst_4 : f32 to vector<8x1xf32>
    %12 = arith.divf %10, %11 : vector<8x1xf32>
    %13 = vector.broadcast %12 : vector<8x1xf32> to vector<8x32xf32>
    %14 = arith.subf %1, %13 : vector<8x32xf32>
    %15 = arith.mulf %14, %14 : vector<8x32xf32>
    %cst_5 = arith.constant dense<0.000000e+00> : vector<8xf32>
    %16 = vector.multi_reduction <add>, %15, %cst_5 [1] : vector<8x32xf32> to vector<8xf32>
    %17 = vector.shape_cast %16 : vector<8xf32> to vector<8x1xf32>
    %cst_6 = arith.constant 3.200000e+01 : f32
    %18 = vector.broadcast %cst_6 : f32 to vector<8x1xf32>
    %19 = arith.divf %17, %18 : vector<8x1xf32>
    %20 = vector.broadcast %12 : vector<8x1xf32> to vector<8x32xf32>
    %21 = arith.subf %1, %20 : vector<8x32xf32>
    %cst_7 = arith.constant 9.99999974E-6 : f32
    %22 = vector.broadcast %cst_7 : f32 to vector<8x1xf32>
    %23 = arith.addf %19, %22 : vector<8x1xf32>
    %24 = math.rsqrt %23 : vector<8x1xf32>
    %25 = vector.broadcast %24 : vector<8x1xf32> to vector<8x32xf32>
    %26 = arith.mulf %21, %25 : vector<8x32xf32>
    %27 = vector.broadcast %3 : vector<1x32xf32> to vector<8x32xf32>
    %28 = arith.mulf %26, %27 : vector<8x32xf32>
    %29 = vector.broadcast %4 : vector<1x32xf32> to vector<8x32xf32>
    %30 = arith.addf %28, %29 : vector<8x32xf32>
    %c0_8 = arith.constant 0 : index
    %c0_9 = arith.constant 0 : index
    %31 = vector.load %arg2[%c0_8, %c0_9] : memref<32x96xf32, #tpu.memory_space<vmem>>, vector<32x96xf32>
    %cst_10 = arith.constant dense<0.000000e+00> : vector<8x96xf32>
    %32 = tpu.matmul %30, %31, %cst_10 {dimension_numbers = #tpu.dot_dimension_numbers<[1], [0], [0], [1], [0, 0, 1, 1], [], []>} : vector<8x32xf32>, vector<32x96xf32>, vector<8x96xf32> -> vector<8x96xf32>
    %33 = vector.extract_strided_slice %32 {offsets = [0, 0], sizes = [8, 32], strides = [1, 1]} : vector<8x96xf32> to vector<8x32xf32>
    %cst_11 = arith.constant 0.353553385 : f32
    %34 = vector.broadcast %cst_11 : f32 to vector<8x32xf32>
    %35 = arith.mulf %33, %34 : vector<8x32xf32>
    %36 = vector.shape_cast %35 : vector<8x32xf32> to vector<8x4x8xf32>
    %37 = vector.extract_strided_slice %32 {offsets = [0, 32], sizes = [8, 32], strides = [1, 1]} : vector<8x96xf32> to vector<8x32xf32>
    %38 = vector.shape_cast %37 : vector<8x32xf32> to vector<8x4x8xf32>
    %39 = vector.extract_strided_slice %32 {offsets = [0, 64], sizes = [8, 32], strides = [1, 1]} : vector<8x96xf32> to vector<8x32xf32>
    %40 = vector.shape_cast %39 : vector<8x32xf32> to vector<8x4x8xf32>
    %41 = tpu.iota {dimensions = array<i32: 0>} : vector<8x8xi32>
    %42 = tpu.iota {dimensions = array<i32: 1>} : vector<8x8xi32>
    %43 = arith.cmpi sle, %42, %41 : vector<8x8xi32>
    "tpu.trace_start"() <{level = 10 : i32, message = "qhd,khd->hqk"}> : () -> ()
    %cst_12 = arith.constant dense<0.000000e+00> : vector<4x8x8xf32>
    %44 = tpu.matmul %36, %38, %cst_12 {dimension_numbers = #tpu.dot_dimension_numbers<[2], [2], [0], [0], [0, 1, 0, 0, 1, 0], [1], [1]>} : vector<8x4x8xf32>, vector<8x4x8xf32>, vector<4x8x8xf32> -> vector<4x8x8xf32>
    %cst_13 = arith.constant -1.000000e+30 : f32
    "tpu.trace_stop"() : () -> ()
    %45 = vector.shape_cast %43 : vector<8x8xi1> to vector<1x8x8xi1>
    %46 = vector.broadcast %45 : vector<1x8x8xi1> to vector<4x8x8xi1>
    %47 = vector.broadcast %cst_13 : f32 to vector<4x8x8xf32>
    %48 = arith.select %46, %44, %47 : vector<4x8x8xi1>, vector<4x8x8xf32>
    %cst_14 = arith.constant dense<0xFF800000> : vector<4x8xf32>
    %49 = vector.multi_reduction <maximumf>, %48, %cst_14 [2] : vector<4x8x8xf32> to vector<4x8xf32>
    %50 = vector.shape_cast %49 : vector<4x8xf32> to vector<4x8x1xf32>
    %51 = vector.broadcast %50 : vector<4x8x1xf32> to vector<4x8x8xf32>
    %52 = arith.subf %48, %51 : vector<4x8x8xf32>
    %53 = math.exp %52 : vector<4x8x8xf32>
    %cst_15 = arith.constant dense<0.000000e+00> : vector<4x8xf32>
    %54 = vector.multi_reduction <add>, %53, %cst_15 [2] : vector<4x8x8xf32> to vector<4x8xf32>
    %55 = vector.shape_cast %54 : vector<4x8xf32> to vector<4x8x1xf32>
    %56 = tpu.reciprocal %55 {approx = true} : vector<4x8x1xf32> -> vector<4x8x1xf32>
    %57 = vector.broadcast %56 : vector<4x8x1xf32> to vector<4x8x8xf32>
    %58 = arith.mulf %53, %57 : vector<4x8x8xf32>
    "tpu.trace_start"() <{level = 10 : i32, message = "hqk,khd->qhd"}> : () -> ()
    %cst_16 = arith.constant dense<0.000000e+00> : vector<4x8x8xf32>
    %59 = tpu.matmul %40, %58, %cst_16 {dimension_numbers = #tpu.dot_dimension_numbers<[0], [2], [2], [1], [0, 1, 0, 2, 1, 1], [1], [0]>} : vector<8x4x8xf32>, vector<4x8x8xf32>, vector<4x8x8xf32> -> vector<4x8x8xf32>
    %60 = tpu.transpose %59, [2, 0, 1] : vector<4x8x8xf32> -> vector<8x4x8xf32>
    "tpu.trace_stop"() : () -> ()
    %61 = vector.shape_cast %60 : vector<8x4x8xf32> to vector<8x32xf32>
    %c0_17 = arith.constant 0 : index
    %c0_18 = arith.constant 0 : index
    %62 = vector.load %arg3[%c0_17, %c0_18] : memref<32x32xf32, #tpu.memory_space<vmem>>, vector<32x32xf32>
    %cst_19 = arith.constant dense<0.000000e+00> : vector<8x32xf32>
    %63 = tpu.matmul %61, %62, %cst_19 {dimension_numbers = #tpu.dot_dimension_numbers<[1], [0], [0], [1], [0, 0, 1, 1], [], []>} : vector<8x32xf32>, vector<32x32xf32>, vector<8x32xf32> -> vector<8x32xf32>
    %64 = vector.broadcast %7 : vector<1x32xf32> to vector<8x32xf32>
    %65 = arith.addf %63, %64 : vector<8x32xf32>
    %66 = arith.addf %1, %65 : vector<8x32xf32>
    %cst_20 = arith.constant dense<0.000000e+00> : vector<8xf32>
    %67 = vector.multi_reduction <add>, %66, %cst_20 [1] : vector<8x32xf32> to vector<8xf32>
    %68 = vector.shape_cast %67 : vector<8xf32> to vector<8x1xf32>
    %cst_21 = arith.constant 3.200000e+01 : f32
    %69 = vector.broadcast %cst_21 : f32 to vector<8x1xf32>
    %70 = arith.divf %68, %69 : vector<8x1xf32>
    %71 = vector.broadcast %70 : vector<8x1xf32> to vector<8x32xf32>
    %72 = arith.subf %66, %71 : vector<8x32xf32>
    %73 = arith.mulf %72, %72 : vector<8x32xf32>
    %cst_22 = arith.constant dense<0.000000e+00> : vector<8xf32>
    %74 = vector.multi_reduction <add>, %73, %cst_22 [1] : vector<8x32xf32> to vector<8xf32>
    %75 = vector.shape_cast %74 : vector<8xf32> to vector<8x1xf32>
    %cst_23 = arith.constant 3.200000e+01 : f32
    %76 = vector.broadcast %cst_23 : f32 to vector<8x1xf32>
    %77 = arith.divf %75, %76 : vector<8x1xf32>
    %78 = vector.broadcast %70 : vector<8x1xf32> to vector<8x32xf32>
    %79 = arith.subf %66, %78 : vector<8x32xf32>
    %cst_24 = arith.constant 9.99999974E-6 : f32
    %80 = vector.broadcast %cst_24 : f32 to vector<8x1xf32>
    %81 = arith.addf %77, %80 : vector<8x1xf32>
    %82 = math.rsqrt %81 : vector<8x1xf32>
    %83 = vector.broadcast %82 : vector<8x1xf32> to vector<8x32xf32>
    %84 = arith.mulf %79, %83 : vector<8x32xf32>
    %85 = vector.broadcast %5 : vector<1x32xf32> to vector<8x32xf32>
    %86 = arith.mulf %84, %85 : vector<8x32xf32>
    %87 = vector.broadcast %6 : vector<1x32xf32> to vector<8x32xf32>
    %88 = arith.addf %86, %87 : vector<8x32xf32>
    %c0_25 = arith.constant 0 : index
    %c0_26 = arith.constant 0 : index
    %89 = vector.load %arg4[%c0_25, %c0_26] : memref<32x128xf32, #tpu.memory_space<vmem>>, vector<32x128xf32>
    %cst_27 = arith.constant dense<0.000000e+00> : vector<8x128xf32>
    %90 = tpu.matmul %88, %89, %cst_27 {dimension_numbers = #tpu.dot_dimension_numbers<[1], [0], [0], [1], [0, 0, 1, 1], [], []>} : vector<8x32xf32>, vector<32x128xf32>, vector<8x128xf32> -> vector<8x128xf32>
    %c0_28 = arith.constant 0 : index
    %c0_29 = arith.constant 0 : index
    %91 = vector.load %arg7[%c0_28, %c0_29] : memref<1x128xf32, #tpu.memory_space<vmem>>, vector<1x128xf32>
    %92 = vector.broadcast %91 : vector<1x128xf32> to vector<8x128xf32>
    %93 = arith.addf %90, %92 : vector<8x128xf32>
    %cst_30 = arith.constant 0.000000e+00 : f32
    %94 = vector.broadcast %cst_30 : f32 to vector<8x128xf32>
    %95 = arith.maximumf %93, %94 : vector<8x128xf32>
    %c0_31 = arith.constant 0 : index
    %c0_32 = arith.constant 0 : index
    %96 = vector.load %arg5[%c0_31, %c0_32] : memref<128x32xf32, #tpu.memory_space<vmem>>, vector<128x32xf32>
    %cst_33 = arith.constant dense<0.000000e+00> : vector<8x32xf32>
    %97 = tpu.matmul %95, %96, %cst_33 {dimension_numbers = #tpu.dot_dimension_numbers<[1], [0], [0], [1], [0, 0, 1, 1], [], []>} : vector<8x128xf32>, vector<128x32xf32>, vector<8x32xf32> -> vector<8x32xf32>
    %98 = vector.broadcast %8 : vector<1x32xf32> to vector<8x32xf32>
    %99 = arith.addf %97, %98 : vector<8x32xf32>
    %100 = arith.addf %66, %99 : vector<8x32xf32>
    %c0_34 = arith.constant 0 : index
    %c0_35 = arith.constant 0 : index
    %c0_36 = arith.constant 0 : index
    %101 = vector.load %arg8[%c0_34, %c0_35, %c0_36] : memref<1x8x32xf32, #tpu.memory_space<vmem>>, vector<1x8x32xf32>
    %102 = vector.shape_cast %101 : vector<1x8x32xf32> to vector<8x32xf32>
    %103 = vector.shape_cast %100 : vector<8x32xf32> to vector<1x8x32xf32>
    tpu.vector_store %arg8[%c0_34, %c0_35, %c0_36], %103 {strides = array<i32>} : memref<1x8x32xf32, #tpu.memory_space<vmem>>, vector<1x8x32xf32>,
    return
  }
  func.func @transform_0(%arg0: i32) -> (i32, i32, i32) {
    %c0_i32 = arith.constant 0 : i32
    %c0_i32_0 = arith.constant 0 : i32
    %c0_i32_1 = arith.constant 0 : i32
    return %arg0, %c0_i32, %c0_i32_0 : i32, i32, i32
  }
  func.func @transform_1(%arg0: i32) -> (i32, i32) {
    %c0_i32 = arith.constant 0 : i32
    %c0_i32_0 = arith.constant 0 : i32
    %c0_i32_1 = arith.constant 0 : i32
    return %c0_i32, %c0_i32_0 : i32, i32
  }
  func.func @transform_2(%arg0: i32) -> (i32, i32) {
    %c0_i32 = arith.constant 0 : i32
    %c0_i32_0 = arith.constant 0 : i32
    %c0_i32_1 = arith.constant 0 : i32
    return %c0_i32, %c0_i32_0 : i32, i32
  }
  func.func @transform_3(%arg0: i32) -> (i32, i32) {
    %c0_i32 = arith.constant 0 : i32
    %c0_i32_0 = arith.constant 0 : i32
    %c0_i32_1 = arith.constant 0 : i32
    return %c0_i32, %c0_i32_0 : i32, i32
  }
  func.func @transform_4(%arg0: i32) -> (i32, i32) {
    %c0_i32 = arith.constant 0 : i32
    %c0_i32_0 = arith.constant 0 : i32
    %c0_i32_1 = arith.constant 0 : i32
    return %c0_i32, %c0_i32_0 : i32, i32
  }
  func.func @transform_5(%arg0: i32) -> (i32, i32) {
    %c0_i32 = arith.constant 0 : i32
    %c0_i32_0 = arith.constant 0 : i32
    %c0_i32_1 = arith.constant 0 : i32
    return %c0_i32, %c0_i32_0 : i32, i32
  }
  func.func @transform_6(%arg0: i32) -> (i32, i32) {
    %c0_i32 = arith.constant 0 : i32
    %c0_i32_0 = arith.constant 0 : i32
    %c0_i32_1 = arith.constant 0 : i32
    return %c0_i32, %c0_i32_0 : i32, i32
  }
  func.func @transform_7(%arg0: i32) -> (i32, i32, i32) {
    %c0_i32 = arith.constant 0 : i32
    %c0_i32_0 = arith.constant 0 : i32
    %c0_i32_1 = arith.constant 0 : i32
    return %arg0, %c0_i32, %c0_i32_0 : i32, i32, i32
  }
}

</mosaic_0001>

<bundles_post_ra>
// kernel: tpu_custom_call.1
= control target key start
LH: loop header
LB: loop body
LE: loop exit
PB: predicated region body
PF: predicated region fallthrough
CT: control target
= control target key end

     0   :  { %12 = vsyncpa [#allocation3], 0  ;;  %s2685_s0 = inlined_call_operand.vmem [shape: f32[2,8,32], index: 0, kind: input, shape index: {}]   ;;  %s2686_s1 = inlined_call_operand.vmem [shape: f32[32,96], index: 1, kind: input, shape index: {}]   ;;  %s2687_s2 = inlined_call_operand.vmem [shape: f32[32,32], index: 2, kind: input, shape index: {}]   ;;  %s2688_s3 = inlined_call_operand.vmem [shape: f32[32,128], index: 3, kind: input, shape index: {}]   ;;  %s2689_s4 = inlined_call_operand.vmem [shape: f32[128,32], index: 4, kind: input, shape index: {}]   ;;  %s2690_s5 = inlined_call_operand.vmem [shape: f32[6,32], index: 5, kind: input, shape index: {}]   ;;  %s2691_s6 = inlined_call_operand.vmem [shape: f32[1,128], index: 6, kind: input, shape index: {}]   ;;  %s2692_s7 = inlined_call_operand.hbm [shape: f32[2,8,32], index: 7, kind: output, shape index: {}]  }
   0x1   :  { %14 = vsyncpa [#allocation3 + $0x1], 0  ;;  %s2373_s24 = smov 0   ;;  %s2375_s25 = smov 0  }
   0x2   :  { %s2377_s26 = smov 0   ;;  %s2379_s27 = smov 0  }
   0x3 LB: > { %s2394_s28 = sadd.s32 4294967295, %s2317_s27   ;;  %s1957_s29 = sadd.s32 4294967294, %s2317_s27   ;;  %s2317_s27 = sphi %s2379_s27, %s2698_s27   ;;  %s2313_s26 = sphi %s2377_s26, %s2697_s26   ;;  %s2309_s25 = sphi %s2375_s25, %s2696_s25   ;;  %s2305_s24 = sphi %s2373_s24, %s2695_s24  }
   0x4   : > { %s2398_s30 = sadd.s32 1, %s2317_s27   ;;  %s179_s8 = sadd.s32 1, %s2313_s26 }
   0x5   : > { %s176_s9 = ssub.s32 %s2317_s27, %s2398_s30  ;;  %p189_p0 = scmp.ne.s32.totalorder %s2313_s26, %s2309_s25 }
   0x6   : > { %p177_p1 = scmp.eq.s32.totalorder %s176_s9, 0  ;;  %p190_p2 = scmp.eq.s32.totalorder %s2394_s28, 1 }
   0x7   : > { %p195_p3 = scmp.ne.s32.totalorder %s2309_s25, %s2305_s24  ;;  %p196_p4 = scmp.eq.s32.totalorder %s1957_s29, 1 }
   0x8   : > { %s2409_s10 = scalar_select %p177_p1, %s2313_s26, %s179_s8  }
   0x9   : > { %p2411_p5 = por %p190_p2, %p189_p0  ;;  %p2415_p6 = por %p196_p4, %p195_p3 }
   0xa   : > { %p1960_p7 = scmp.ge.s32.totalorder %s2317_s27, 1  ;;  %p239_p8 = scmp.lt.s32.totalorder %s2317_s27, 3 }
   0xc   : > { %p240_p9 = pnand %p1960_p7, %p239_p8 }
   0xd   : > { %p270_p10 = scmp.lt.s32.totalorder (!%p240_p9), %s2394_s28, 1  ;;  %vm276_vm0 = vcmask (!%p240_p9), 261120   ;;  %v301_v7 = vld [vmem:[%s2686_s1] sm:$0xff] (!%p240_p9)  ;;  %v302_v8 = vld [vmem:[%s2686_s1 + $0x8] sm:$0xff] (!%p240_p9)  ;;  %v303_v9 = vld [vmem:[%s2686_s1 + $0x10] sm:$0xff] (!%p240_p9)  ;;  %v2319_v10 = vmov (!%p240_p9), 0.0|0.0   ;;  %v291_v17 = vlaneseq (!%p240_p9) }
   0xe   : > { %243 = sbr.rel (%p240_p9) target bundleno = 2929 (0xb71), region = 48  ;;  %2141 = vmatprep.subr.bf16.mxu0 (!%p240_p9), %v2319_v10  ;;  %v2142_v11 = vpack.c.bf16 (!%p240_p9), %v302_v8, %v301_v7  ;;  %v304_v12 = vld [vmem:[%s2686_s1 + $0x18] sm:$0xff] (!%p240_p9)  ;;  %vm2320_vm1 = vmmov (!%p240_p9), 0   ;;  %v2321_v13 = vmov (!%p240_p9), 0.0   ;;  %v2459_v21 = vld [vmem:[%s2690_s5] sm:$0x3f] (!%p240_p9) }
   0xf   : > { %2041 = vmatprep.mubr.msk.f32.mxu0 (!%p240_p9), %vm2320_vm1, %v2321_v13  ;;  %2054 = vmatprep.subr.mxu1 (!%p240_p9), %v2321_v13  ;;  %v2145_v14 = vpack.c.bf16 (!%p240_p9), %v304_v12, %v303_v9  ;;  %v2453_v19 = vshrl.u32 (!%p240_p9), %v291_v17, 7  ;;  %s2323_s15 = smov (!%p240_p9), 120   ;;  %s2324_s16 = smov (!%p240_p9), 112   ;;  %vm538_vm2 = vcmask (!%p240_p9), 64512   ;;  %v396_v46 = vand.u32 (!%p240_p9), 127, %v291_v17 }
  0x10   : > { %2056 = vmatprep.mubr.msk.f32.mxu1 (!%p240_p9), %vm2320_vm1, %v2321_v13  ;;  %2143 = vmatpush3.bf16.msra.mxu0 (!%p240_p9), %v2142_v11  ;;  %s2326_s18 = smov (!%p240_p9), 64   ;;  %vm1598_vm4 = vcmask (!%p240_p9), 130048   ;;  %vm1600_vm5 = vcmask (!%p240_p9), 195584   ;;  %s2332_s8 = smov (!%p240_p9), [#allocation2]  }
  0x11   : > { %2144 = vmatprep.subr.bf16.mxu0 (!%p240_p9), %v2319_v10  ;;  %v293_v20 = vsub.s32 (!%p240_p9), 0, %v2453_v19  ;;  %v298_v22 = vsub.s32 (!%p240_p9), 1, %v2453_v19  ;;  %vm397_vm3 = vcmp.le.s32.totalorder (!%p240_p9), %v396_v46, %v2453_v19  ;;  %s2259_s9 = sshll.u32 (!%p240_p9), %s2332_s8, 4  ;;  %s2260_s9 = int_to_ptr.vmem [resolvable:$false] %s2259_s9 }
  0x13   : > { %v294_v23 = vrot.slane (!%p240_p9), %v2459_v21, %v293_v20  ;;  %v299_v26 = vrot.slane (!%p240_p9), %v2459_v21, %v298_v22 }
  0x14   : > { %2146 = vmatpush3.bf16.msra.mxu0 (!%p240_p9), %v2145_v14 }
  0x15   : > { %s271_s13 = scalar_select %p270_p10, %s2394_s28, 1  ;;  %2044 = vmatprep.subr.mxu0 %v2321_v13 }
  0x17   : > { %s1962_s14 = sshll.u32 %s271_s13, 3  ;;  %s2329_s13 = smov 16  }
  0x18   : > { %s273_s17 = scalar_lea.vmem %s2685_s0, %s1962_s14  ;;  %s2322_s14 = smov 104  }
  0x19   : > { %v2426_v0 = vld [vmem:[%s273_s17] sm:$0xff]  ;;  %s2325_s17 = smov 96  }
  0x1a   : > { %v277_v1 = vsel %vm276_vm0, %v2426_v0, 0.0 }
  0x1b   : > { %278 = vadd.xlane.f32.xlu0 %v277_v1 }
  0xa8   : > { %v279_v2 = vpop.xlane.xlu0 %278 }
  0xa9   : > { %v281_v3 = vmul.f32 0.03125, %v279_v2 }
  0xab   : > { %v282_v4 = vsub.f32 %v2426_v0, %v281_v3 }
  0xad   : > { %v283_v5 = vmul.f32 %v282_v4, %v282_v4 }
  0xaf   : > { %v284_v6 = vsel %vm276_vm0, %v283_v5, 0.0 }
  0xb0   : > { %285 = vadd.xlane.f32.xlu0 %v284_v6 }
 0x13d   : > { %v286_v15 = vpop.xlane.xlu0 %285 }
 0x13e   : > { %v287_v16 = vmul.f32 0.03125, %v286_v15 }
 0x140   : > { %v288_v18 = vadd.f32 1e-05, %v287_v16 }
 0x142   : > { %2235 = vrsqrt.f32 %v288_v18 }
 0x14c   : > { %v2236_v24 = vpop.eup %2235 }
 0x14d   : > { %v290_v25 = vmul.f32 %v2236_v24, %v282_v4 }
 0x14f   : > { %v295_v27 = vmul.f32 %v294_v23, %v290_v25 }
 0x151   : > { %v300_v28 = vadd.f32 %v299_v26, %v295_v27 }
 0x153   : > { %2042 = vmatmul.mubr.msk.f32.vlgmr.msra.gmra.mrb[0].mxu0 %vm276_vm0, %v300_v28 }
 0x154   : > { %2046 = vmatprep.mubr.msk.f32.mxu0 %vm2320_vm1, %v2321_v13 }
 0x226   : > { %v374_v29 = vpop.f32.mrb[0].mxu0 }
 0x227   : > { %391 = vrot.lane.b32.xlu0 %v374_v29, %s2322_s14  ;;  %387 = vrot.lane.b32.xlu1 %v374_v29, %s2323_s15  ;;  %v2043_v30 = vpop.f32.mrb[1].mxu0  ;;  %v378_v31 = vmul.f32 0.35355338, %v374_v29 }
 0x22b   : > { %389 = vrot.lane.b32.xlu1 %v374_v29, %s2324_s16  ;;  %384 = vrot.lane.b32.xlu0 %v378_v31, %s2322_s14  ;;  %s2330_s14 = smov 8  }
 0x22f   : > { %398 = vrot.lane.b32.xlu1 %v374_v29, %s2325_s17 }
 0x299   : > { %v2467_v32 = vpop.permute.xlu1 %387  ;;  %v392_v34 = vpop.permute.xlu0 %391 }
 0x29a   : > { %400 = vrot.lane.b32.xlu1 %v2467_v32, %s2325_s17 }
 0x29d   : > { %v2470_v33 = vpop.permute.xlu1 %389  ;;  %v385_v42 = vpop.permute.xlu0 %384 }
 0x29e   : > { %402 = vrot.lane.b32.xlu1 %v2470_v33, %s2325_s17 }
 0x2a1   : > { %v399_v35 = vpop.permute.xlu1 %398 }
 0x2a2   : > { %404 = vrot.lane.b32.xlu1 %v392_v34, %s2325_s17 }
 0x2a6   : > { %380 = vrot.lane.b32.xlu1 %v378_v31, %s2323_s15  ;;  %s2331_s15 = smov 24  }
 0x2aa   : > { %382 = vrot.lane.b32.xlu1 %v378_v31, %s2324_s16  ;;  %s267_s16 = sand.u32 1, %s2309_s25  }
 0x2ab   : > { %s1961_s17 = sshll.u32 %s267_s16, 3  ;;  %s1885_s29 = scalar_lea.sflag [#allocation3], %s267_s16 }
 0x2ac   : > { %s269_s19 = scalar_lea.vmem [#allocation2], %s1961_s17 }
 0x2ad   : > { %s1898_s20 = sshll.u32 %s269_s19, 4  ;;  %s2644_s20 = int_to_ptr.vmem [resolvable:$true] %s1898_s20 }
 0x2ae   : > { %p2262_p0 = scmp.lt.s32.totalorder %s2644_s20, %s2260_s9 }
 0x2d3   : > { %410 = vxpose.xlu1.b32.start.end [1/1] (short) (narrow) %v399_v35, 8 }
 0x30c   : > { %v401_v36 = vpop.permute.xlu1 %400 }
 0x30d   : > { %442 = vxpose.xlu0.b32.start.end [1/1] (short) (narrow) %v401_v36, 8 }
 0x310   : > { %v403_v37 = vpop.permute.xlu1 %402 }
 0x311   : > { %474 = vxpose.xlu0.b32.start.end [1/1] (short) (narrow) %v403_v37, 8 }
 0x314   : > { %v405_v38 = vpop.permute.xlu1 %404 }
 0x315   : > { %506 = vxpose.xlu0.b32.start.end [1/1] (short) (narrow) %v405_v38, 8 }
 0x318   : > { %v381_v39 = vpop.permute.xlu1 %380 }
 0x31c   : > { %v383_v40 = vpop.permute.xlu1 %382 }
 0x353   : > { %v426_v41 = vpop.trf.xlu1 }
 0x354   : > { %2045 = vmatpush3.msra.mxu0 %v426_v41 }
 0x355   : > { %2047 = vmatmul.mubr.msk.f32.vlgmr.msra.gmra.mrb[2].mxu0 %vm538_vm2, %v378_v31  ;;  %2049 = vmatprep.subr.mxu0 %v2321_v13 }
 0x356   : > { %2051 = vmatprep.mubr.msk.f32.mxu0 %vm2320_vm1, %v2321_v13 }
 0x38d   : > { %v458_v43 = vpop.trf.xlu0 }
 0x38e   : > { %2050 = vmatpush3.msra.mxu0 %v458_v43 }
 0x38f   : > { %2052 = vmatmul.mubr.msk.f32.vlgmr.msra.gmra.mrb[4].mxu0 %vm538_vm2, %v381_v39  ;;  %2059 = vmatprep.subr.mxu0 %v2321_v13 }
 0x390   : > { %2061 = vmatprep.mubr.msk.f32.mxu0 %vm2320_vm1, %v2321_v13 }
 0x391   : > { %v490_v44 = vpop.trf.xlu0 }
 0x392   : > { %2055 = vmatpush3.msra.mxu1 %v490_v44 }
 0x393   : > { %2057 = vmatmul.mubr.msk.f32.vlgmr.msra.gmra.mrb[0].mxu1 %vm538_vm2, %v383_v40  ;;  %2064 = vmatprep.subr.mxu1 %v2321_v13 }
 0x394   : > { %2066 = vmatprep.mubr.msk.f32.mxu1 %vm2320_vm1, %v2321_v13 }
 0x395   : > { %v522_v45 = vpop.trf.xlu0 }
 0x396   : > { %2060 = vmatpush3.msra.mxu0 %v522_v45 }
 0x397   : > { %2062 = vmatmul.mubr.msk.f32.vlgmr.msra.gmra.mrb[6].mxu0 %vm538_vm2, %v385_v42  ;;  %2069 = vmatprep.subr.mxu0 %v2321_v13 }
 0x398   : > { %2071 = vmatprep.mubr.msk.f32.mxu0 %vm2320_vm1, %v2321_v13 }
 0x428   : > { %v607_v47 = vpop.f32.mrb[2].mxu0 }
 0x429   : > { %v829_v48 = vsel %vm397_vm3, %v607_v47, -1e+30  ;;  %v2048_v49 = vpop.f32.mrb[3].mxu0 }
 0x42a   : > { %v833_v50 = vsel %vm538_vm2, %v829_v48, -inf }
 0x42b   : > { %834 = vmax.xlane.f32.xlu0 %v833_v50 }
 0x441   : > { %877 = vrot.lane.b32.xlu0 %v374_v29, %s2326_s18 }
 0x445   : > { %883 = vrot.lane.b32.xlu0 %v392_v34, %s2326_s18 }
 0x462   : > { %v679_v51 = vpop.f32.mrb[4].mxu0 }
 0x463   : > { %v830_v52 = vsel %vm397_vm3, %v679_v51, -1e+30  ;;  %v2053_v53 = vpop.f32.mrb[5].mxu0 }
 0x464   : > { %v836_v54 = vsel %vm538_vm2, %v830_v52, -inf  ;;  %v1603_v53 = vld [vmem:[%s2687_s2 + $0x8] sm:$0xff] }
 0x465   : > { %837 = vmax.xlane.f32.xlu1 %v836_v54 }
 0x466   : > { %v751_v55 = vpop.f32.mrb[0].mxu1 }
 0x467   : > { %v831_v56 = vsel %vm397_vm3, %v751_v55, -1e+30  ;;  %v2058_v57 = vpop.f32.mrb[1].mxu1 }
 0x468   : > { %v839_v58 = vsel %vm538_vm2, %v831_v56, -inf }
 0x469   : > { %840 = vmax.xlane.f32.xlu1 %v839_v58  ;;  %v2328_v58 = vmov 1934713408  }
 0x46a   : > { %v823_v59 = vpop.f32.mrb[6].mxu0 }
 0x46b   : > { %v832_v60 = vsel %vm397_vm3, %v823_v59, -1e+30  ;;  %v2063_v61 = vpop.f32.mrb[7].mxu0  ;;  %v1484_v59 = vunpack.c.l.s4 %v2328_v58 }
 0x46c   : > { %v842_v62 = vsel %vm538_vm2, %v832_v60, -inf }
 0x46d   : > { %843 = vmax.xlane.f32.xlu1 %v842_v62 }
 0x47e   : > { %879 = vrot.lane.b32.xlu1 %v2467_v32, %s2326_s18 }
 0x482   : > { %881 = vrot.lane.b32.xlu1 %v2470_v33, %s2326_s18  ;;  %s1982_s18 = sshll.u32 %s2394_s28, 7  ;;  %s2255_s28 = scalar_lea.vmem %s2644_s20, 128 }
 0x483   : > { %s2642_s23 = scalar_lea.hbm %s2692_s7, %s1982_s18  ;;  %p2256_p11 = scmp.ne.s32.totalorder %s2644_s20, %s2255_s28 }
 0x485   : > { %p2257_p12 = pnand %p2256_p11, %p2411_p5 }
 0x487   : > { %p2258_p13 = pneg %p2257_p12 }
 0x4b8   : > { %v835_v63 = vpop.xlane.xlu0 %834 }
 0x4b9   : > { %v845_v1 = vsub.f32 %v829_v48, %v835_v63  ;;  %v1485_v63 = vunpack.c.0.s8 %v1484_v59 }
 0x4bb   : > { %v849_v2 = vmul.f32 1.442695, %v845_v1 }
 0x4bc   : > { %v878_v25 = vpop.permute.xlu0 %877 }
 0x4bd   : > { %2237 = vpow2.f32 %v849_v2 }
 0x4c0   : > { %v884_v27 = vpop.permute.xlu0 %883 }
 0x4c7   : > { %v2238_v3 = vpop.eup %2237 }
 0x4c8   : > { %v857_v4 = vsel %vm538_vm2, %v2238_v3, 0.0 }
 0x4c9   : > { %858 = vadd.xlane.f32.xlu1 %v857_v4 }
 0x4f2   : > { %v838_v5 = vpop.xlane.xlu1 %837 }
 0x4f3   : > { %v846_v6 = vsub.f32 %v830_v52, %v838_v5  ;;  %v1602_v52 = vld [vmem:[%s2687_s2] sm:$0xff] }
 0x4f4   : > { %v2148_v54 = vpack.c.bf16 %v1603_v53, %v1602_v52  ;;  %v1608_v53 = vsub.s32 4, %v2453_v19 }
 0x4f5   : > { %v851_v7 = vmul.f32 1.442695, %v846_v6 }
 0x4f6   : > { %v841_v8 = vpop.xlane.xlu1 %840 }
 0x4f7   : > { %2239 = vpow2.f32 %v851_v7  ;;  %v847_v9 = vsub.f32 %v831_v56, %v841_v8  ;;  %v2327_v56 = vmov 1983009808   ;;  %v1488_v7 = vsub.s32 %v1485_v63, %v2453_v19 }
 0x4f8   : > { %v1452_v57 = vunpack.c.l.s4 %v2327_v56 }
 0x4f9   : > { %v853_v11 = vmul.f32 1.442695, %v847_v9 }
 0x4fa   : > { %v844_v12 = vpop.xlane.xlu1 %843 }
 0x4fb   : > { %2241 = vpow2.f32 %v853_v11  ;;  %v848_v14 = vsub.f32 %v832_v60, %v844_v12  ;;  %v1453_v60 = vunpack.c.0.s8 %v1452_v57 }
 0x4fd   : > { %v855_v15 = vmul.f32 1.442695, %v848_v14  ;;  %v1456_v1 = vsub.s32 %v1453_v60, %v2453_v19 }
 0x4fe   : > { %v880_v24 = vpop.permute.xlu1 %879 }
 0x4ff   : > { %2243 = vpow2.f32 %v855_v15 }
 0x501   : > { %v2240_v16 = vpop.eup %2239 }
 0x502   : > { %v860_v17 = vsel %vm538_vm2, %v2240_v16, 0.0  ;;  %v882_v26 = vpop.permute.xlu1 %881 }
 0x503   : > { %861 = vadd.xlane.f32.xlu0 %v860_v17 }
 0x505   : > { %v2242_v18 = vpop.eup %2241 }
 0x506   : > { %v863_v20 = vsel %vm538_vm2, %v2242_v18, 0.0 }
 0x507   : > { %864 = vadd.xlane.f32.xlu0 %v863_v20  ;;  %v1605_v20 = vld [vmem:[%s2687_s2 + $0x18] sm:$0xff] }
 0x509   : > { %v2244_v22 = vpop.eup %2243 }
 0x50a   : > { %v866_v23 = vsel %vm538_vm2, %v2244_v22, 0.0 }
 0x50b   : > { %867 = vadd.xlane.f32.xlu1 %v866_v23 }
 0x534   : > { %889 = vxpose.xlu0.b32.start.end [1/1] (short) (narrow) %v878_v25, 8 }
 0x538   : > { %953 = vxpose.xlu0.b32.start.end [1/1] (short) (narrow) %v882_v26, 8 }
 0x53c   : > { %985 = vxpose.xlu0.b32.start.end [1/1] (short) (narrow) %v884_v27, 8 }
 0x53e   : > { %921 = vxpose.xlu1.b32.start.end [1/1] (short) (narrow) %v880_v24, 8 }
 0x556   : > { %v859_v28 = vpop.xlane.xlu1 %858 }
 0x557   : > { %2245 = vrcp.f32 %v859_v28 }
 0x561   : > { %v2246_v29 = vpop.eup %2245 }
 0x562   : > { %v873_v30 = vmul.f32 %v2246_v29, %v2238_v3 }
 0x564   : > { %2065 = vmatpush3.xpose.msk.msra.mxu1 %vm538_vm2, %v873_v30 }
 0x565   : > { %2074 = vmatprep.subr.mxu1 %v2321_v13 }
 0x590   : > { %v862_v31 = vpop.xlane.xlu0 %861 }
 0x591   : > { %2247 = vrcp.f32 %v862_v31 }
 0x594   : > { %v865_v34 = vpop.xlane.xlu0 %864 }
 0x595   : > { %2249 = vrcp.f32 %v865_v34 }
 0x598   : > { %v868_v35 = vpop.xlane.xlu1 %867 }
 0x599   : > { %2251 = vrcp.f32 %v868_v35 }
 0x59b   : > { %v2248_v32 = vpop.eup %2247 }
 0x59c   : > { %v874_v33 = vmul.f32 %v2248_v32, %v2240_v16 }
 0x59e   : > { %2070 = vmatpush3.xpose.msk.msra.mxu0 %vm538_vm2, %v874_v33 }
 0x59f   : > { %2079 = vmatprep.subr.mxu0 %v2321_v13  ;;  %v2250_v36 = vpop.eup %2249 }
 0x5a0   : > { %v875_v37 = vmul.f32 %v2250_v36, %v2242_v18  ;;  %v1604_v18 = vld [vmem:[%s2687_s2 + $0x10] sm:$0xff] }
 0x5a1   : > { %v2151_v26 = vpack.c.bf16 %v1605_v20, %v1604_v18  ;;  %v1799_v18 = vld [vmem:[%s2689_s4 + $0x38] sm:$0xff] }
 0x5a3   : > { %v2252_v40 = vpop.eup %2251 }
 0x5a4   : > { %v876_v41 = vmul.f32 %v2252_v40, %v2244_v22 }
 0x5b4   : > { %v905_v38 = vpop.trf.xlu0 }
 0x5b5   : > { %2067 = vmatmul.mubr.msk.f32.vlgmr.msra.gmra.mrb[2].mxu1 %vm538_vm2, %v905_v38 }
 0x5b6   : > { %2075 = vmatpush3.xpose.msk.msra.mxu1 %vm538_vm2, %v875_v37  ;;  %2076 = vmatprep.mubr.msk.f32.mxu1 %vm2320_vm1, %v2321_v13 }
 0x5b7   : > { %2159 = vmatprep.subr.bf16.mxu1 %v2319_v10 }
 0x5b8   : > { %v969_v39 = vpop.trf.xlu0 }
 0x5b9   : > { %2077 = vmatmul.mubr.msk.f32.vlgmr.msra.gmra.mrb[4].mxu1 %vm538_vm2, %v969_v39 }
 0x5ba   : > { %2138 = vmatprep.mubr.msk.f32.mxu1 %vm2320_vm1, %v2321_v13 }
 0x5bc   : > { %v1001_v43 = vpop.trf.xlu0 }
 0x5be   : > { %v937_v42 = vpop.trf.xlu1 }
 0x5bf   : > { %2072 = vmatmul.mubr.msk.f32.vlgmr.msra.gmra.mrb[8].mxu0 %vm538_vm2, %v937_v42 }
 0x5c0   : > { %2080 = vmatpush3.xpose.msk.msra.mxu0 %vm538_vm2, %v876_v41  ;;  %2081 = vmatprep.mubr.msk.f32.mxu0 %vm2320_vm1, %v2321_v13 }
 0x5c1   : > { %2147 = vmatprep.subr.bf16.mxu0 %v2319_v10 }
 0x5c3   : > { %2082 = vmatmul.mubr.msk.f32.vlgmr.msra.gmra.mrb[10].mxu0 %vm538_vm2, %v1001_v43 }
 0x5c4   : > { %2092 = vmatprep.mubr.msk.f32.mxu0 %vm2320_vm1, %v2321_v13  ;;  %2149 = vmatpush3.bf16.msra.mxu0 %v2148_v54  ;;  %v1609_v54 = vrot.slane %v2459_v21, %v1608_v53 }
 0x5c5   : > { %2150 = vmatprep.subr.bf16.mxu0 %v2319_v10 }
 0x5c8   : > { %2152 = vmatpush3.bf16.msra.mxu0 %v2151_v26  ;;  %v1803_v26 = vld [vmem:[%s2689_s4 + $0x58] sm:$0xff] }
 0x5c9   : > { %2153 = vmatprep.subr.bf16.mxu0 %v2319_v10 }
 0x688   : > { %v1089_v44 = vpop.f32.mrb[2].mxu1 }
 0x689   : > { %v2068_v45 = vpop.f32.mrb[3].mxu1  ;;  %1321 = vxpose.xlu0.b32.start.end [1/1] (short) (narrow) %v1089_v44, 8 }
 0x68c   : > { %v1241_v46 = vpop.f32.mrb[4].mxu1 }
 0x68d   : > { %v2078_v47 = vpop.f32.mrb[5].mxu1  ;;  %1385 = vxpose.xlu0.b32.start.end [1/1] (short) (narrow) %v1241_v46, 8 }
 0x692   : > { %v1165_v48 = vpop.f32.mrb[8].mxu0 }
 0x693   : > { %1353 = vxpose.xlu1.b32.start.end [1/1] (short) (narrow) %v1165_v48, 8  ;;  %v2073_v49 = vpop.f32.mrb[9].mxu0 }
 0x696   : > { %v1317_v50 = vpop.f32.mrb[10].mxu0 }
 0x697   : > { %1417 = vxpose.xlu1.b32.start.end [1/1] (short) (narrow) %v1317_v50, 8  ;;  %v2083_v51 = vpop.f32.mrb[11].mxu0 }
 0x709   : > { %v1337_v55 = vpop.trf.xlu0 }
 0x70d   : > { %v1401_v62 = vpop.trf.xlu0 }
 0x70e   : > { %v1449_v2 = vcombine.low %v1337_v55, %v1401_v62  ;;  %v1450_v3 = vcombine.high %v1337_v55, %v1401_v62 }
 0x710   : > { %v1457_v8 = vrot.slane %v1449_v2, %v1456_v1  ;;  %v1464_v9 = vrot.slane %v1450_v3, %v1456_v1  ;;  %v1709_v3 = vld [vmem:[%s2688_s3 + $0x10] sm:$0xff] }
 0x713   : > { %v1369_v61 = vpop.trf.xlu1 }
 0x717   : > { %v1433_v4 = vpop.trf.xlu1 }
 0x718   : > { %v1465_v5 = vcombine.low %v1369_v61, %v1433_v4  ;;  %v1466_v6 = vcombine.high %v1369_v61, %v1433_v4  ;;  %v1710_v4 = vld [vmem:[%s2688_s3 + $0x18] sm:$0xff] }
 0x71a   : > { %v1473_v11 = vrot.slane %v1465_v5, %v1456_v1  ;;  %v1480_v12 = vrot.slane %v1466_v6, %v1456_v1  ;;  %v2157_v5 = vpack.c.bf16 %v1710_v4, %v1709_v3  ;;  %v1792_v6 = vld [vmem:[%s2689_s4] sm:$0xff] }
 0x71c   : > { %v1481_v14 = vcombine.low %v1457_v8, %v1473_v11  ;;  %v1482_v15 = vcombine.high %v1457_v8, %v1473_v11  ;;  %v1497_v16 = vcombine.low %v1464_v9, %v1480_v12  ;;  %v1498_v17 = vcombine.high %v1464_v9, %v1480_v12  ;;  %v1794_v8 = vld [vmem:[%s2689_s4 + $0x10] sm:$0xff]  ;;  %v1795_v11 = vld [vmem:[%s2689_s4 + $0x18] sm:$0xff] }
 0x71d   : > { %v2163_v12 = vpack.c.bf16 %v1795_v11, %v1794_v8 }
 0x71e   : > { %v1489_v22 = vrot.slane %v1481_v14, %v1488_v7  ;;  %v1496_v23 = vrot.slane %v1482_v15, %v1488_v7  ;;  %v1505_v24 = vrot.slane %v1497_v16, %v1488_v7  ;;  %v1512_v25 = vrot.slane %v1498_v17, %v1488_v7  ;;  %v1796_v14 = vld [vmem:[%s2689_s4 + $0x20] sm:$0xff]  ;;  %v1797_v15 = vld [vmem:[%s2689_s4 + $0x28] sm:$0xff]  ;;  %v1798_v17 = vld [vmem:[%s2689_s4 + $0x30] sm:$0xff] }
 0x71f   : > { %v2166_v16 = vpack.c.bf16 %v1797_v15, %v1796_v14  ;;  %v2169_v20 = vpack.c.bf16 %v1799_v18, %v1798_v17 }
 0x720   : > { %v1517_v27 = vcombine.low %v1489_v22, %v1496_v23  ;;  %v1976_v28 = vcombine.high %v1489_v22, %v1496_v23  ;;  %v1533_v29 = vcombine.low %v1505_v24, %v1512_v25  ;;  %v1977_v30 = vcombine.high %v1505_v24, %v1512_v25  ;;  %v1800_v22 = vld [vmem:[%s2689_s4 + $0x40] sm:$0xff]  ;;  %v1801_v23 = vld [vmem:[%s2689_s4 + $0x48] sm:$0xff]  ;;  %v1802_v25 = vld [vmem:[%s2689_s4 + $0x50] sm:$0xff] }
 0x721   : > { %v2172_v24 = vpack.c.bf16 %v1801_v23, %v1800_v22 }
 0x722   : > { %v1524_v31 = vrot.slane %v1517_v27, %v1456_v1  ;;  %v1532_v32 = vrot.slane %v1976_v28, %v1456_v1  ;;  %v1540_v33 = vrot.slane %v1533_v29, %v1456_v1  ;;  %v1548_v34 = vrot.slane %v1977_v30, %v1456_v1  ;;  %v1707_v1 = vld [vmem:[%s2688_s3] sm:$0xff]  ;;  %v1805_v29 = vld [vmem:[%s2689_s4 + $0x68] sm:$0xff] }
 0x723   : > { %v2175_v27 = vpack.c.bf16 %v1803_v26, %v1802_v25  ;;  %v1804_v28 = vld [vmem:[%s2689_s4 + $0x60] sm:$0xff] }
 0x724   : > { %v1550_v35 = vcombine.high %v1524_v31, %v1532_v32  ;;  %v1566_v36 = vcombine.high %v1540_v33, %v1548_v34  ;;  %v1549_v37 = vcombine.low %v1524_v31, %v1532_v32  ;;  %v1565_v38 = vcombine.low %v1540_v33, %v1548_v34 }
 0x725   : > { %v2178_v30 = vpack.c.bf16 %v1805_v29, %v1804_v28  ;;  %v1699_v34 = vsub.s32 2, %v2453_v19 }
 0x726   : > { %v1564_v39 = vrot.slane %v1550_v35, %v1488_v7  ;;  %v1580_v40 = vrot.slane %v1566_v36, %v1488_v7  ;;  %v1557_v41 = vrot.slane %v1549_v37, %v1488_v7  ;;  %v1573_v42 = vrot.slane %v1565_v38, %v1488_v7  ;;  %v1793_v7 = vld [vmem:[%s2689_s4 + $0x8] sm:$0xff] }
 0x727   : > { %v2160_v9 = vpack.c.bf16 %v1793_v7, %v1792_v6  ;;  %v1704_v35 = vsub.s32 3, %v2453_v19  ;;  %v1700_v36 = vrot.slane %v2459_v21, %v1699_v34 }
 0x728   : > { %v1583_v43 = vcombine.low %v1564_v39, %v1580_v40  ;;  %v1582_v44 = vcombine.high %v1557_v41, %v1573_v42  ;;  %v1581_v45 = vcombine.low %v1557_v41, %v1573_v42  ;;  %v1584_v46 = vcombine.high %v1564_v39, %v1580_v40  ;;  %v1807_v42 = vld [vmem:[%s2689_s4 + $0x78] sm:$0xff] }
 0x729   : > { %2161 = vmatpush3.bf16.msra.mxu1 %v2160_v9  ;;  %v1705_v39 = vrot.slane %v2459_v21, %v1704_v35 }
 0x72a   : > { %1590 = vrot.lane.b32.xlu1 %v1583_v43, %s2329_s13  ;;  %1586 = vrot.lane.b32.xlu0 %v1582_v44, %s2330_s14  ;;  %v1979_v44 = vld [vmem:[%s2691_s6] ss:$0 sm:$0xff]  ;;  %s2261_s13 = scalar_lea.vmem %s2260_s9, 256 }
 0x72b   : > { %2162 = vmatprep.subr.bf16.mxu1 %v2319_v10  ;;  %p2263_p1 = scmp.lt.s32.totalorder %s2261_s13, %s2255_s28 }
 0x72d   : > { %2164 = vmatpush3.bf16.msra.mxu1 %v2163_v12  ;;  %p2264_p2 = por %p2263_p1, %p2262_p0 }
 0x72e   : > { %1594 = vrot.lane.b32.xlu1 %v1584_v46, %s2331_s15  ;;  %2165 = vmatprep.subr.bf16.mxu1 %v2319_v10 }
 0x72f   : > { %p2265_p3 = pnand %p2264_p2, %p2258_p13 }
 0x731   : > { %2167 = vmatpush3.bf16.msra.mxu1 %v2166_v16 }
 0x732   : > { %2168 = vmatprep.subr.bf16.mxu1 %v2319_v10 }
 0x735   : > { %2170 = vmatpush3.bf16.msra.mxu1 %v2169_v20 }
 0x736   : > { %2171 = vmatprep.subr.bf16.mxu1 %v2319_v10 }
 0x739   : > { %2173 = vmatpush3.bf16.msra.mxu1 %v2172_v24 }
 0x73a   : > { %2174 = vmatprep.subr.bf16.mxu1 %v2319_v10 }
 0x73d   : > { %2176 = vmatpush3.bf16.msra.mxu1 %v2175_v27 }
 0x73e   : > { %2177 = vmatprep.subr.bf16.mxu1 %v2319_v10 }
 0x741   : > { %2179 = vmatpush3.bf16.msra.mxu1 %v2178_v30 }
 0x742   : > { %2180 = vmatprep.subr.bf16.mxu1 %v2319_v10 }
 0x79c   : > { %v1591_v47 = vpop.permute.xlu1 %1590  ;;  %v1587_v48 = vpop.permute.xlu0 %1586 }
 0x79d   : > { %v1597_v49 = vsel %vm538_vm2, %v1581_v45, %v1587_v48 }
 0x79e   : > { %v1599_v51 = vsel %vm1598_vm4, %v1597_v49, %v1591_v47  ;;  %v1810_v49 = vsub.s32 5, %v2453_v19 }
 0x7a0   : > { %v1595_v50 = vpop.permute.xlu1 %1594 }
 0x7a1   : > { %v1601_v52 = vsel %vm1600_vm5, %v1599_v51, %v1595_v50  ;;  %v1811_v50 = vrot.slane %v2459_v21, %v1810_v49 }
 0x7a2   : > { %2093 = vmatmul.mubr.msk.f32.vlgmr.msra.gmra.mrb[12].mxu0 %vm276_vm0, %v1601_v52 }
 0x7a3   : > { %2103 = vmatprep.mubr.msk.f32.mxu0 %vm2320_vm1, %v2321_v13 }
 0x875   : > { %v1679_v55 = vpop.f32.mrb[12].mxu0 }
 0x876   : > { %v1680_v56 = vadd.f32 %v1679_v55, %v1609_v54  ;;  %v2094_v57 = vpop.f32.mrb[13].mxu0 }
 0x878   : > { %v2552_v58 = vadd.f32 %v1680_v56, %v2426_v0  ;;  %v1708_v0 = vld [vmem:[%s2688_s3 + $0x8] sm:$0xff] }
 0x879   : > { %v2154_v2 = vpack.c.bf16 %v1708_v0, %v1707_v1 }
 0x87a   : > { %v1684_v59 = vsel %vm276_vm0, %v2552_v58, 0.0 }
 0x87b   : > { %1685 = vadd.xlane.f32.xlu1 %v1684_v59  ;;  %2155 = vmatpush3.bf16.msra.mxu0 %v2154_v2 }
 0x87c   : > { %2156 = vmatprep.subr.bf16.mxu0 %v2319_v10  ;;  %v1806_v10 = vld [vmem:[%s2689_s4 + $0x70] sm:$0xff] }
 0x87d   : > { %v2181_v43 = vpack.c.bf16 %v1807_v42, %v1806_v10 }
 0x87f   : > { %2158 = vmatpush3.bf16.msra.mxu0 %v2157_v5  ;;  %2182 = vmatpush3.bf16.msra.mxu1 %v2181_v43 }
 0x908   : > { %v1686_v60 = vpop.xlane.xlu1 %1685 }
 0x909   : > { %v1687_v61 = vmul.f32 0.03125, %v1686_v60 }
 0x90b   : > { %v1688_v62 = vsub.f32 %v2552_v58, %v1687_v61 }
 0x90d   : > { %v1689_v63 = vmul.f32 %v1688_v62, %v1688_v62 }
 0x90f   : > { %v1690_v13 = vsel %vm276_vm0, %v1689_v63, 0.0 }
 0x910   : > { %1691 = vadd.xlane.f32.xlu0 %v1690_v13 }
 0x99d   : > { %v1692_v31 = vpop.xlane.xlu0 %1691 }
 0x99e   : > { %v1693_v32 = vmul.f32 0.03125, %v1692_v31 }
 0x9a0   : > { %v1694_v33 = vadd.f32 1e-05, %v1693_v32 }
 0x9a2   : > { %2253 = vrsqrt.f32 %v1694_v33 }
 0x9ac   : > { %v2254_v37 = vpop.eup %2253 }
 0x9ad   : > { %v1696_v38 = vmul.f32 %v2254_v37, %v1688_v62 }
 0x9af   : > { %v1701_v40 = vmul.f32 %v1700_v36, %v1696_v38 }
 0x9b1   : > { %v1706_v41 = vadd.f32 %v1705_v39, %v1701_v40 }
 0x9b3   : > { %2104 = vmatmul.mubr.msk.f32.vlgmr.msra.gmra.mrb[14].mxu0 %vm276_vm0, %v1706_v41 }
 0xa86   : > { %v1787_v45 = vpop.f32.mrb[14].mxu0 }
 0xa87   : > { %v1788_v46 = vadd.f32 %v1979_v44, %v1787_v45  ;;  %v2105_v47 = vpop.f32.mrb[15].mxu0 }
 0xa89   : > { %v1791_v48 = vmax.f32 %v1788_v46, 0.0 }
 0xa8b   : > { %2139 = vmatmul.mubr.f32.vlgmr.msra.gmra.mrb[6].mxu1 %v1791_v48 }
 0xb5e   : > { %v1878_v51 = vpop.f32.mrb[6].mxu1 }
 0xb5f   : > { %v1879_v52 = vadd.f32 %v1878_v51, %v1811_v50  ;;  %v2140_v53 = vpop.f32.mrb[7].mxu1 }
 0xb61   : > { %v1882_v54 = vadd.f32 %v1879_v52, %v2552_v58 }
 0xb63   : > { %1883 = vst.msk [vmem:[%s269_s19] sm:$0xff] %vm276_vm0, %v1882_v54 }
 0xb64   : > { %2268 = shalt.err (!%p2265_p3)
}
 0xb65   : > { %s2269_s14 = scalar_lea.hbm %s2642_s23, 128  ;;  %s2273_s17 = scalar_lea.hbm %s2692_s7, 256 }
 0xb66   : > { %p2270_p4 = scmp.ne.s32.totalorder %s2642_s23, %s2269_s14  ;;  %p2274_p9 = scmp.lt.u32.totalorder %s2642_s23, %s2692_s7 }
 0xb67   : > { %p2275_p10 = scmp.lt.u32.totalorder %s2273_s17, %s2269_s14  ;;  %p2277_p12 = scmp.lt.u32.totalorder %s2269_s14, %s2642_s23 }
 0xb68   : > { %p2271_p7 = pnand %p2270_p4, %p2411_p5 }
 0xb69   : > { %p2276_p11 = por %p2275_p10, %p2274_p9 }
 0xb6a   : > { %p2272_p8 = pneg %p2271_p7 }
 0xb6b   : > { %p2278_p13 = por %p2277_p12, %p2276_p11 }
 0xb6d   : > { %p2279_p0 = pnand %p2278_p13, %p2272_p8 }
 0xb6f   : > { %2282 = shalt.err (!%p2279_p0)
}
 0xb70   : > { %2183 = dma.vmem_to_hbm [thread:$0]  (%p2411_p5), %s2644_s20, 128, %s2642_s23, %s1885_s29  }
 0xb71 PF: > { %p2189_p1 = scmp.ge.s32.totalorder %s2317_s27, 2  ;;  %s1910_s21 = sand.u32 1, %s2305_s24  }
 0xb72   : > { %s1911_s22 = scalar_lea.sflag [#allocation3], %s1910_s21 }
 0xb73   : > { %p2186_p2 = pnand %p2189_p1, %p2415_p6 }
 0xb75   : > { %2300 = dma.done.wait (!%p2186_p2), %s1911_s22, 128  }
 0xb76   : > { %2302 = vsyncadd (!%p2186_p2), %s1911_s22, 4294967168  ;;  %p17_p3 = scmp.ge.s32.totalorder %s2398_s30, 4   ;;  %s2695_s24 = smov %s2309_s25 }
 0xb77   : > { %s2696_s25 = smov %s2313_s26  ;;  %s2697_s26 = smov %s2409_s10 }
 0xb78   : > { %s2698_s27 = smov %s2398_s30  ;;  %19 = sbr.rel (!%p17_p3) target bundleno = 3 (0x3), region = 83 }
 0xb7f   :  { %1916 = vsyncpa [#allocation3], 1 }
 0xb80   :  { %1918 = vsyncpa [#allocation3 + $0x1], 1 }

</bundles_post_ra>
